<compile_context>
chip_gen: v6e
topology: v6e:2x2x1
jax: 0.10.0
libtpu: 0.0.40
codegen_flags: <defaults>
</compile_context>

<pallas_src>
import jax
import jax.numpy as jnp
from jax.experimental import pallas as pl
from jax.experimental.pallas import tpu as pltpu


def _generalnet_kernel(x_ref,
                       w1_ref, b1_ref,
                       w2_ref, b2_ref,
                       w3_ref, b3_ref,
                       w4_ref, b4_ref,
                       o_ref):
    """Fused feature-major MLP forward for one batch tile.

    x_ref  : (TB, in)   -- streamed per grid step (batch-major in HBM)
    wN_ref : (out, in)  -- PyTorch-layout weights, VMEM-resident (const index map)
    bN_ref : (out, 1)   -- biases, lane-broadcast against (out, TB)
    o_ref  : (1, TB)    -- lane-dense transposed output tile
    """
    x = x_ref[...]

    # Layer 1 (24): (24, in) . (TB, in)^T -> (24, TB).  The only transposed
    # contraction; everything downstream is lane-dense feature-major.
    h = jax.lax.dot_general(
        w1_ref[...], x,
        dimension_numbers=(((1,), (1,)), ((), ())),
        preferred_element_type=jnp.float32)
    h = jnp.maximum(h + b1_ref[...], 0.0)

    # Layer 2 (12): (12, 24) @ (24, TB) -> (12, TB)
    h = jnp.maximum(
        jnp.dot(w2_ref[...], h.astype(w2_ref.dtype),
                preferred_element_type=jnp.float32) + b2_ref[...],
        0.0)

    # Layer 3 (6): (6, 12) @ (12, TB) -> (6, TB)
    h = jnp.maximum(
        jnp.dot(w3_ref[...], h.astype(w3_ref.dtype),
                preferred_element_type=jnp.float32) + b3_ref[...],
        0.0)

    # Head (1): (1, 6) @ (6, TB) -> (1, TB); lane-dense unmasked store.
    out_t = jnp.dot(w4_ref[...], h.astype(w4_ref.dtype),
                    preferred_element_type=jnp.float32) + b4_ref[...]
    o_ref[...] = out_t.astype(o_ref.dtype)


def _round_up(x, m):
    return ((x + m - 1) // m) * m


def generalnet_forward(x, params, *, block_batch=8192, compute_dtype=jnp.float32):
    """params: list of (W, b) with W: (out, in) [PyTorch layout], b: (out,).

    Returns (batch, 1) float32.
    """
    batch, in_features = x.shape
    assert params[0][0].shape[1] == in_features
    out_features = params[-1][0].shape[0]
    assert out_features == 1

    # ---- batch tiling -------------------------------------------------------
    batch_128 = _round_up(batch, 128)                 # minimum lane-dense tile
    tb = _round_up(min(block_batch, batch_128), 128)
    # Megacore (v7x: 2 TCs/chip): ensure >= 2 grid steps when the batch allows
    # it, so dimension_semantics=("parallel",) can actually shard the grid.
    if batch_128 // tb < 2 and tb >= 256:
        tb = _round_up((batch_128 + 1) // 2, 128)
    batch_p = _round_up(batch, tb)
    if batch_p != batch:
        x = jnp.pad(x, ((0, batch_p - batch), (0, 0)))
    grid = (batch_p // tb,)

    # ---- param prep: (out, in) weights as-is; biases -> (out, 1) f32 --------
    ws = [w.astype(compute_dtype) for w, _ in params]
    bs = [b.reshape(-1, 1).astype(jnp.float32) for _, b in params]
    x = x.astype(compute_dtype)

    def const(shape):
        # Constant index map -> parameter stays VMEM-resident across all steps;
        # only the x / out tiles are re-DMA'd each grid step.
        return pl.BlockSpec(shape, lambda i: (0, 0))

    itemsize = jnp.dtype(compute_dtype).itemsize
    flops = 2 * batch_p * sum(int(w.shape[0]) * int(w.shape[1]) for w, _ in params)
    param_bytes = sum(int(w.size) * itemsize for w in ws) + sum(int(b.size) * 4 for b in bs)
    bytes_accessed = int(batch_p * in_features * itemsize
                         + batch_p * out_features * 4
                         + param_bytes)

    fn = pl.pallas_call(
        _generalnet_kernel,
        out_shape=jax.ShapeDtypeStruct((1, batch_p), jnp.float32),
        grid=grid,
        in_specs=[
            # x: streamed (TB, in) tiles, double-buffered by the BlockSpec pipeline.
            pl.BlockSpec((tb, in_features), lambda i: (i, 0)),
            const(ws[0].shape), const(bs[0].shape),
            const(ws[1].shape), const(bs[1].shape),
            const(ws[2].shape), const(bs[2].shape),
            const(ws[3].shape), const(bs[3].shape),
        ],
        out_specs=pl.BlockSpec((1, tb), lambda i: (0, i)),
        compiler_params=pltpu.CompilerParams(
            dimension_semantics=("parallel",),        # shard batch grid across TCs (v7x)
            # ~18 MiB peak at TB=16384 with the lane-padded x double buffer;
            # 48 MiB cap is safe on v7x (64 MiB physical) and required on v5e
            # (16 MiB scoped default).  v5e/v6e may raise to ~64 MiB for TB=32768.
            vmem_limit_bytes=48 * 1024 * 1024,
        ),
        cost_estimate=pl.CostEstimate(
            flops=flops, transcendentals=0, bytes_accessed=bytes_accessed),
    )
    out_t = fn(x, ws[0], bs[0], ws[1], bs[1], ws[2], bs[2], ws[3], bs[3])
    # (1, batch_p) -> (batch, 1); padded rows dropped.
    return out_t.reshape(batch_p, 1)[:batch]


def init_params(key, in_features, arch=(24, 12, 6), out_features=1):
    """PyTorch nn.Linear-style params: W (out, in), b (out,); U(-1/sqrt(fan_in), +)."""
    dims = [in_features] + list(arch) + [out_features]
    params = []
    for i in range(len(dims) - 1):
        fan_in, fan_out = dims[i], dims[i + 1]
        key, kw, kb = jax.random.split(key, 3)
        bound = 1.0 / (fan_in ** 0.5)
        w = jax.random.uniform(kw, (fan_out, fan_in), jnp.float32,
                               minval=-bound, maxval=bound)
        b = jax.random.uniform(kb, (fan_out,), jnp.float32,
                               minval=-bound, maxval=bound)
        params.append((w, b))
    return params


def reference_forward(x, params):
    """Plain-JAX reference (matches the PyTorch module with batch_norm=False)."""
    h = x
    for i, (w, b) in enumerate(params):
        h = h @ w.T + b
        if i < len(params) - 1:
            h = jnp.maximum(h, 0.0)
    return h


if __name__ == "__main__":
    key = jax.random.PRNGKey(0)
    k_x, k_p, k_x2 = jax.random.split(key, 3)

    batch, in_features = 8, 32
    x = jax.random.normal(k_x, (batch, in_features), jnp.float32)
    params = init_params(k_p, in_features)

    # Small-batch check (single grid step, padded up to 128 lanes).
    out = generalnet_forward(x, params)
    out = jax.block_until_ready(out)
    ref = reference_forward(x, params)
    assert out.shape == (batch, 1), out.shape
    assert jnp.allclose(out, ref, atol=1e-4, rtol=1e-4), (out, ref)

    # Ragged multi-tile check (exercises grid streaming + padding + megacore split).
    batch2 = 300
    x2 = jax.random.normal(k_x2, (batch2, in_features), jnp.float32)
    out2 = generalnet_forward(x2, params, block_batch=128)   # grid = (3,)
    out2 = jax.block_until_ready(out2)
    ref2 = reference_forward(x2, params)
    assert out2.shape == (batch2, 1), out2.shape
    assert jnp.allclose(out2, ref2, atol=1e-4, rtol=1e-4)

    print("KERNEL_OK")
</pallas_src>

<mosaic_0001>
module attributes {stable_mosaic.version = 11 : i64} {
  func.func @_generalnet_kernel(%arg0: i32, %arg1: memref<128x32xf32, #tpu.memory_space<vmem>>, %arg2: memref<24x32xf32, #tpu.memory_space<vmem>>, %arg3: memref<24x1xf32, #tpu.memory_space<vmem>>, %arg4: memref<12x24xf32, #tpu.memory_space<vmem>>, %arg5: memref<12x1xf32, #tpu.memory_space<vmem>>, %arg6: memref<6x12xf32, #tpu.memory_space<vmem>>, %arg7: memref<6x1xf32, #tpu.memory_space<vmem>>, %arg8: memref<1x6xf32, #tpu.memory_space<vmem>>, %arg9: memref<1x1xf32, #tpu.memory_space<vmem>>, %arg10: memref<1x128xf32, #tpu.memory_space<vmem>>) attributes {dimension_semantics = [#tpu.dimension_semantics<parallel>], iteration_bounds = array<i64: 1>, scalar_prefetch = 0 : i64, scratch_operands = 0 : i64, tpu.core_type = #tpu.core_type<tc>, window_params = [{transform_indices = @transform_0, window_bounds = array<i64: 128, 32>}, {pipeline_mode = #tpu.pipeline_mode<synchronous>, transform_indices = @transform_1, window_bounds = array<i64: 24, 32>}, {pipeline_mode = #tpu.pipeline_mode<synchronous>, transform_indices = @transform_2, window_bounds = array<i64: 24, 1>}, {pipeline_mode = #tpu.pipeline_mode<synchronous>, transform_indices = @transform_3, window_bounds = array<i64: 12, 24>}, {pipeline_mode = #tpu.pipeline_mode<synchronous>, transform_indices = @transform_4, window_bounds = array<i64: 12, 1>}, {pipeline_mode = #tpu.pipeline_mode<synchronous>, transform_indices = @transform_5, window_bounds = array<i64: 6, 12>}, {pipeline_mode = #tpu.pipeline_mode<synchronous>, transform_indices = @transform_6, window_bounds = array<i64: 6, 1>}, {pipeline_mode = #tpu.pipeline_mode<synchronous>, transform_indices = @transform_7, window_bounds = array<i64: 1, 6>}, {pipeline_mode = #tpu.pipeline_mode<synchronous>, transform_indices = @transform_8, window_bounds = array<i64: 1, 1>}, {transform_indices = @transform_9, window_bounds = array<i64: 1, 128>}]} {
    %c0 = arith.constant 0 : index
    %c0_0 = arith.constant 0 : index
    %0 = vector.load %arg1[%c0, %c0_0] : memref<128x32xf32, #tpu.memory_space<vmem>>, vector<128x32xf32>
    %c0_1 = arith.constant 0 : index
    %c0_2 = arith.constant 0 : index
    %1 = vector.load %arg2[%c0_1, %c0_2] : memref<24x32xf32, #tpu.memory_space<vmem>>, vector<24x32xf32>
    %cst = arith.constant dense<0.000000e+00> : vector<24x128xf32>
    %2 = tpu.matmul %1, %0, %cst {dimension_numbers = #tpu.dot_dimension_numbers<[1], [1], [0], [0], [0, 0, 1, 0], [], []>} : vector<24x32xf32>, vector<128x32xf32>, vector<24x128xf32> -> vector<24x128xf32>
    %c0_3 = arith.constant 0 : index
    %c0_4 = arith.constant 0 : index
    %3 = vector.load %arg3[%c0_3, %c0_4] : memref<24x1xf32, #tpu.memory_space<vmem>>, vector<24x1xf32>
    %4 = vector.broadcast %3 : vector<24x1xf32> to vector<24x128xf32>
    %5 = arith.addf %2, %4 : vector<24x128xf32>
    %cst_5 = arith.constant 0.000000e+00 : f32
    %6 = vector.broadcast %cst_5 : f32 to vector<24x128xf32>
    %7 = arith.maximumf %5, %6 : vector<24x128xf32>
    %c0_6 = arith.constant 0 : index
    %c0_7 = arith.constant 0 : index
    %8 = vector.load %arg4[%c0_6, %c0_7] : memref<12x24xf32, #tpu.memory_space<vmem>>, vector<12x24xf32>
    %cst_8 = arith.constant dense<0.000000e+00> : vector<12x128xf32>
    %9 = tpu.matmul %8, %7, %cst_8 {dimension_numbers = #tpu.dot_dimension_numbers<[1], [0], [0], [1], [0, 0, 1, 1], [], []>} : vector<12x24xf32>, vector<24x128xf32>, vector<12x128xf32> -> vector<12x128xf32>
    %c0_9 = arith.constant 0 : index
    %c0_10 = arith.constant 0 : index
    %10 = vector.load %arg5[%c0_9, %c0_10] : memref<12x1xf32, #tpu.memory_space<vmem>>, vector<12x1xf32>
    %11 = vector.broadcast %10 : vector<12x1xf32> to vector<12x128xf32>
    %12 = arith.addf %9, %11 : vector<12x128xf32>
    %cst_11 = arith.constant 0.000000e+00 : f32
    %13 = vector.broadcast %cst_11 : f32 to vector<12x128xf32>
    %14 = arith.maximumf %12, %13 : vector<12x128xf32>
    %c0_12 = arith.constant 0 : index
    %c0_13 = arith.constant 0 : index
    %15 = vector.load %arg6[%c0_12, %c0_13] : memref<6x12xf32, #tpu.memory_space<vmem>>, vector<6x12xf32>
    %cst_14 = arith.constant dense<0.000000e+00> : vector<6x128xf32>
    %16 = tpu.matmul %15, %14, %cst_14 {dimension_numbers = #tpu.dot_dimension_numbers<[1], [0], [0], [1], [0, 0, 1, 1], [], []>} : vector<6x12xf32>, vector<12x128xf32>, vector<6x128xf32> -> vector<6x128xf32>
    %c0_15 = arith.constant 0 : index
    %c0_16 = arith.constant 0 : index
    %17 = vector.load %arg7[%c0_15, %c0_16] : memref<6x1xf32, #tpu.memory_space<vmem>>, vector<6x1xf32>
    %18 = vector.broadcast %17 : vector<6x1xf32> to vector<6x128xf32>
    %19 = arith.addf %16, %18 : vector<6x128xf32>
    %cst_17 = arith.constant 0.000000e+00 : f32
    %20 = vector.broadcast %cst_17 : f32 to vector<6x128xf32>
    %21 = arith.maximumf %19, %20 : vector<6x128xf32>
    %c0_18 = arith.constant 0 : index
    %c0_19 = arith.constant 0 : index
    %22 = vector.load %arg8[%c0_18, %c0_19] : memref<1x6xf32, #tpu.memory_space<vmem>>, vector<1x6xf32>
    %cst_20 = arith.constant dense<0.000000e+00> : vector<1x128xf32>
    %23 = tpu.matmul %22, %21, %cst_20 {dimension_numbers = #tpu.dot_dimension_numbers<[1], [0], [0], [1], [0, 0, 1, 1], [], []>} : vector<1x6xf32>, vector<6x128xf32>, vector<1x128xf32> -> vector<1x128xf32>
    %c0_21 = arith.constant 0 : index
    %c0_22 = arith.constant 0 : index
    %24 = vector.load %arg9[%c0_21, %c0_22] : memref<1x1xf32, #tpu.memory_space<vmem>>, vector<1x1xf32>
    %25 = vector.broadcast %24 : vector<1x1xf32> to vector<1x128xf32>
    %26 = arith.addf %23, %25 : vector<1x128xf32>
    %c0_23 = arith.constant 0 : index
    %c0_24 = arith.constant 0 : index
    %27 = vector.load %arg10[%c0_23, %c0_24] : memref<1x128xf32, #tpu.memory_space<vmem>>, vector<1x128xf32>
    tpu.vector_store %arg10[%c0_23, %c0_24], %26 {strides = array<i32>} : memref<1x128xf32, #tpu.memory_space<vmem>>, vector<1x128xf32>,
    return
  }
  func.func @transform_0(%arg0: i32) -> (i32, i32) {
    %c0_i32 = arith.constant 0 : i32
    %c0_i32_0 = arith.constant 0 : i32
    return %arg0, %c0_i32 : i32, i32
  }
  func.func @transform_1(%arg0: i32) -> (i32, i32) {
    %c0_i32 = arith.constant 0 : i32
    %c0_i32_0 = arith.constant 0 : i32
    %c0_i32_1 = arith.constant 0 : i32
    return %c0_i32, %c0_i32_0 : i32, i32
  }
  func.func @transform_2(%arg0: i32) -> (i32, i32) {
    %c0_i32 = arith.constant 0 : i32
    %c0_i32_0 = arith.constant 0 : i32
    %c0_i32_1 = arith.constant 0 : i32
    return %c0_i32, %c0_i32_0 : i32, i32
  }
  func.func @transform_3(%arg0: i32) -> (i32, i32) {
    %c0_i32 = arith.constant 0 : i32
    %c0_i32_0 = arith.constant 0 : i32
    %c0_i32_1 = arith.constant 0 : i32
    return %c0_i32, %c0_i32_0 : i32, i32
  }
  func.func @transform_4(%arg0: i32) -> (i32, i32) {
    %c0_i32 = arith.constant 0 : i32
    %c0_i32_0 = arith.constant 0 : i32
    %c0_i32_1 = arith.constant 0 : i32
    return %c0_i32, %c0_i32_0 : i32, i32
  }
  func.func @transform_5(%arg0: i32) -> (i32, i32) {
    %c0_i32 = arith.constant 0 : i32
    %c0_i32_0 = arith.constant 0 : i32
    %c0_i32_1 = arith.constant 0 : i32
    return %c0_i32, %c0_i32_0 : i32, i32
  }
  func.func @transform_6(%arg0: i32) -> (i32, i32) {
    %c0_i32 = arith.constant 0 : i32
    %c0_i32_0 = arith.constant 0 : i32
    %c0_i32_1 = arith.constant 0 : i32
    return %c0_i32, %c0_i32_0 : i32, i32
  }
  func.func @transform_7(%arg0: i32) -> (i32, i32) {
    %c0_i32 = arith.constant 0 : i32
    %c0_i32_0 = arith.constant 0 : i32
    %c0_i32_1 = arith.constant 0 : i32
    return %c0_i32, %c0_i32_0 : i32, i32
  }
  func.func @transform_8(%arg0: i32) -> (i32, i32) {
    %c0_i32 = arith.constant 0 : i32
    %c0_i32_0 = arith.constant 0 : i32
    %c0_i32_1 = arith.constant 0 : i32
    return %c0_i32, %c0_i32_0 : i32, i32
  }
  func.func @transform_9(%arg0: i32) -> (i32, i32) {
    %c0_i32 = arith.constant 0 : i32
    %c0_i32_0 = arith.constant 0 : i32
    return %c0_i32, %arg0 : i32, i32
  }
}

</mosaic_0001>

<bundles_post_ra>
// kernel: tpu_custom_call.1
= control target key start
LH: loop header
LB: loop body
LE: loop exit
PB: predicated region body
PF: predicated region fallthrough
CT: control target
= control target key end

     0   :  { %s842_s0 = inlined_call_operand.vmem [shape: f32[128,32], index: 0, kind: input, shape index: {}]   ;;  %s843_s1 = inlined_call_operand.vmem [shape: f32[24,32], index: 1, kind: input, shape index: {}]   ;;  %s844_s2 = inlined_call_operand.vmem [shape: f32[24,1], index: 2, kind: input, shape index: {}]   ;;  %s845_s3 = inlined_call_operand.vmem [shape: f32[12,24], index: 3, kind: input, shape index: {}]   ;;  %s846_s4 = inlined_call_operand.vmem [shape: f32[12,1], index: 4, kind: input, shape index: {}]   ;;  %s847_s5 = inlined_call_operand.vmem [shape: f32[6,12], index: 5, kind: input, shape index: {}]   ;;  %s848_s6 = inlined_call_operand.vmem [shape: f32[6,1], index: 6, kind: input, shape index: {}]   ;;  %s849_s7 = inlined_call_operand.vmem [shape: f32[1,6], index: 7, kind: input, shape index: {}]   ;;  %s850_s8 = inlined_call_operand.<no memory space> [shape: f32[1,1], index: 8, kind: input, shape index: {}]   ;;  %s851_s9 = inlined_call_operand.hbm [shape: f32[1,128], index: 9, kind: output, shape index: {}]  }
   0x1   :  { %v14_v0 = vstv %s850_s8 }
   0x2   :  { %15 = vst [vmem:[#allocation2] sm:$0x1] %v14_v0 }
   0x3   :  { %v50_v1 = vld [vmem:[%s842_s0 + $0x78] sm:$0xff]  ;;  %vm72_vm0 = vcmask 261120   ;;  %v645_v2 = vmov 0.0   ;;  %vm646_vm1 = vmmov 0   ;;  %v647_v3 = vmov 0   ;;  %v49_v4 = vld [vmem:[%s842_s0 + $0x70] sm:$0xff] }
   0x4   :  { %555 = vmatprep.subr.mxu0 %v645_v2  ;;  %587 = vmatprep.mubr.msk.f32.mxu0 %vm646_vm1, %v645_v2  ;;  %v56_v5 = vld [vmem:[%s844_s2 + $0x10] sm:$0xff]  ;;  %v48_v6 = vld [vmem:[%s842_s0 + $0x68] sm:$0xff]  ;;  %v54_v7 = vld [vmem:[%s844_s2] sm:$0xff] }
   0x5   :  { %556 = vmatpush3.xpose.msk.msra.mxu0 %vm72_vm0, %v50_v1  ;;  %621 = vset.pattern.permute.xlu0 %v647_v3  ;;  %v55_v8 = vld [vmem:[%s844_s2 + $0x8] sm:$0xff] }
   0x6   :  { %557 = vmatprep.subr.mxu0 %v645_v2  ;;  %622 = vset.pattern.permute.xlu1 %v647_v3 }
   0x7   :  { %69 = vperm.xlu0 %621, %v56_v5   ;;  %59 = vperm.xlu1 %622, %v54_v7  }
   0x9   :  { %558 = vmatpush3.xpose.msk.msra.mxu0 %vm72_vm0, %v49_v4 }
   0xa   :  { %559 = vmatprep.subr.mxu0 %v645_v2 }
   0xb   :  { %16 = vsyncpa [#allocation4], 0  ;;  %v216_v9 = vld [vmem:[%s846_s4 + $0x8] sm:$0xf]  ;;  %v47_v10 = vld [vmem:[%s842_s0 + $0x60] sm:$0xff]  ;;  %64 = vperm.xlu0 %621, %v55_v8   ;;  %vm227_vm2 = vcmask 195584   ;;  %v404_v61 = vlaneseq }
   0xc   :  { %v215_v11 = vld [vmem:[%s846_s4] sm:$0xff]  ;;  %224 = vperm.xlu1 %622, %v216_v9   ;;  %v46_v13 = vld [vmem:[%s842_s0 + $0x58] sm:$0xff]  ;;  %v45_v15 = vld [vmem:[%s842_s0 + $0x50] sm:$0xff]  ;;  %vm322_vm3 = vcmask 1043456   ;;  %vm318_vm4 = vcmask 97280   ;;  %vm412_vm5 = vcmask 1045504  }
   0xd   :  { %560 = vmatpush3.xpose.msk.msra.mxu0 %vm72_vm0, %v48_v6  ;;  %v312_v12 = vld [vmem:[%s848_s6] sm:$0x3f]  ;;  %v44_v16 = vld [vmem:[%s842_s0 + $0x48] sm:$0xff]  ;;  %v42_v18 = vld [vmem:[%s842_s0 + $0x38] sm:$0xff]  ;;  %vm408_vm6 = vcmask 48128   ;;  %v405_v62 = vshrl.u32 %v404_v61, 7 }
   0xe   :  { %561 = vmatprep.subr.mxu0 %v645_v2  ;;  %v398_v14 = vld [vmem:[#allocation2] sm:$0x1]  ;;  %v41_v19 = vld [vmem:[%s842_s0 + $0x30] sm:$0xff]  ;;  %v40_v20 = vld [vmem:[%s842_s0 + $0x28] sm:$0xff] }
   0xf   :  { %219 = vperm.xlu0 %621, %v215_v11   ;;  %v43_v17 = vld [vmem:[%s842_s0 + $0x40] sm:$0xff]  ;;  %v38_v22 = vld [vmem:[%s842_s0 + $0x18] sm:$0xff]  ;;  %v37_v23 = vld [vmem:[%s842_s0 + $0x10] sm:$0xff]  ;;  %v406_v63 = vsub.s32 0, %v405_v62 }
  0x10   :  { %315 = vperm.xlu1 %622, %v312_v12   ;;  %v39_v21 = vld [vmem:[%s842_s0 + $0x20] sm:$0xff]  ;;  %v36_v24 = vld [vmem:[%s842_s0 + $0x8] sm:$0xff]  ;;  %v53_v28 = vld [vmem:[%s843_s1 + $0x10] sm:$0xff] }
  0x11   :  { %562 = vmatpush3.xpose.msk.msra.mxu0 %vm72_vm0, %v47_v10  ;;  %v35_v25 = vld [vmem:[%s842_s0] sm:$0xff]  ;;  %v52_v27 = vld [vmem:[%s843_s1 + $0x8] sm:$0xff] }
  0x12   :  { %563 = vmatprep.subr.mxu0 %v645_v2  ;;  %v51_v26 = vld [vmem:[%s843_s1] sm:$0xff]  ;;  %v214_v45 = vld [vmem:[%s845_s3 + $0x8] sm:$0xf] }
  0x13   :  { %401 = vperm.xlu0 %621, %v398_v14   ;;  %v213_v29 = vld [vmem:[%s845_s3] sm:$0xff] }
  0x14   :  { %602 = vmatprep.mubr.msk.f32.mxu1 %vm227_vm2, %v213_v29  ;;  %v311_v54 = vld [vmem:[%s847_s5] sm:$0x3f]  ;;  %s648_s5 = smov [#allocation3]  }
  0x15   :  { %564 = vmatpush3.xpose.msk.msra.mxu0 %vm72_vm0, %v46_v13  ;;  %v397_v60 = vld [vmem:[%s849_s7] sm:$0x1]  ;;  %s493_s15 = sshll.u32 %s648_s5, 4  ;;  %s494_s15 = int_to_ptr.vmem [resolvable:$true] %s493_s15 }
  0x16   :  { %565 = vmatprep.subr.mxu0 %v645_v2  ;;  %s623_s16 = scalar_lea.vmem %s494_s15, 16  ;;  %s627_s17 = scalar_lea.vmem %s494_s15, 32 }
  0x17   :  { %p624_p0 = scmp.ne.s32.totalorder %s494_s15, %s623_s16  ;;  %p628_p1 = scmp.lt.s32.totalorder %s494_s15, %s494_s15 }
  0x18   :  { %p629_p2 = scmp.lt.s32.totalorder %s627_s17, %s623_s16 }
  0x19   :  { %566 = vmatpush3.xpose.msk.msra.mxu0 %vm72_vm0, %v45_v15 }
  0x1a   :  { %567 = vmatprep.subr.mxu0 %v645_v2  ;;  %p630_p3 = por %p629_p2, %p628_p1 }
  0x1c   :  { %p631_p4 = pnand %p630_p3, %p624_p0 }
  0x1d   :  { %568 = vmatpush3.xpose.msk.msra.mxu0 %vm72_vm0, %v44_v16 }
  0x1e   :  { %569 = vmatprep.subr.mxu0 %v645_v2 }
  0x21   :  { %570 = vmatpush3.xpose.msk.msra.mxu0 %vm72_vm0, %v43_v17 }
  0x22   :  { %571 = vmatprep.subr.mxu0 %v645_v2 }
  0x25   :  { %572 = vmatpush3.xpose.msk.msra.mxu0 %vm72_vm0, %v42_v18 }
  0x26   :  { %573 = vmatprep.subr.mxu0 %v645_v2 }
  0x29   :  { %574 = vmatpush3.xpose.msk.msra.mxu0 %vm72_vm0, %v41_v19 }
  0x2a   :  { %575 = vmatprep.subr.mxu0 %v645_v2 }
  0x2d   :  { %576 = vmatpush3.xpose.msk.msra.mxu0 %vm72_vm0, %v40_v20 }
  0x2e   :  { %577 = vmatprep.subr.mxu0 %v645_v2 }
  0x31   :  { %578 = vmatpush3.xpose.msk.msra.mxu0 %vm72_vm0, %v39_v21 }
  0x32   :  { %579 = vmatprep.subr.mxu0 %v645_v2 }
  0x35   :  { %580 = vmatpush3.xpose.msk.msra.mxu0 %vm72_vm0, %v38_v22 }
  0x36   :  { %581 = vmatprep.subr.mxu0 %v645_v2 }
  0x39   :  { %582 = vmatpush3.xpose.msk.msra.mxu0 %vm72_vm0, %v37_v23 }
  0x3a   :  { %583 = vmatprep.subr.mxu0 %v645_v2 }
  0x3d   :  { %584 = vmatpush3.xpose.msk.msra.mxu0 %vm72_vm0, %v36_v24 }
  0x3e   :  { %585 = vmatprep.subr.mxu0 %v645_v2 }
  0x41   :  { %586 = vmatpush3.xpose.msk.msra.mxu0 %vm72_vm0, %v35_v25 }
  0x44   :  { %588 = vmatmul.mubr.msk.f32.vlgmr.msra.gmra.mxu0 %vm72_vm0, %v51_v26 }
  0x45   :  { %590 = vmatprep.mubr.msk.f32.mxu0 %vm646_vm1, %v645_v2 }
  0x48   :  { %591 = vmatmul.mubr.msk.f32.gmra.mxu0 %vm72_vm0, %v52_v27 }
  0x49   :  { %593 = vmatprep.mubr.msk.f32.mxu0 %vm646_vm1, %v645_v2 }
  0x4c   :  { %594 = vmatmul.mubr.msk.f32.gmra.mxu0 %vm72_vm0, %v53_v28 }
  0x82   :  { %v70_v31 = vpop.permute.xlu0 %69  ;;  %v60_v35 = vpop.permute.xlu1 %59 }
  0x86   :  { %v65_v36 = vpop.permute.xlu0 %64 }
  0x87   :  { %v225_v46 = vpop.permute.xlu1 %224 }
  0x8a   :  { %v220_v49 = vpop.permute.xlu0 %219 }
  0x8b   :  { %v316_v55 = vpop.permute.xlu1 %315 }
  0x8e   :  { %v402_v0 = vpop.permute.xlu0 %401 }
  0x8f   :  { %v407_v1 = vrot.slane %v402_v0, %v406_v63 }
 0x104   :  { %v196_v30 = vpop.f32.mrf.mxu0 }
 0x105   :  { %v197_v41 = vadd.f32 %v196_v30, %v60_v35 }
 0x106   :  { %v589_v32 = vpop.f32.mrf.mxu0 }
 0x107   :  { %v210_v44 = vmax.f32 %v197_v41, 0.0 }
 0x108   :  { %v201_v33 = vpop.f32.mrf.mxu0 }
 0x109   :  { %v202_v38 = vadd.f32 %v201_v33, %v65_v36 }
 0x10a   :  { %v592_v34 = vpop.f32.mrf.mxu0 }
 0x10b   :  { %v211_v43 = vmax.f32 %v202_v38, 0.0 }
 0x10c   :  { %v206_v37 = vpop.f32.mrf.mxu0 }
 0x10d   :  { %v207_v39 = vadd.f32 %v206_v37, %v70_v31 }
 0x10e   :  { %v595_v40 = vpop.f32.mrf.mxu0 }
 0x10f   :  { %v212_v42 = vmax.f32 %v207_v39, 0.0 }
 0x111   :  { %596 = vmatprep.subr.mxu1 %v212_v42 }
 0x112   :  { %597 = vmatpush3.msra.mxu1 %v212_v42 }
 0x113   :  { %598 = vmatprep.subr.mxu1 %v211_v43 }
 0x114   :  { %599 = vmatpush3.msra.mxu1 %v211_v43 }
 0x115   :  { %600 = vmatprep.subr.mxu1 %v210_v44 }
 0x116   :  { %601 = vmatpush3.msra.mxu1 %v210_v44 }
 0x117   :  { %603 = vmatmul.mubr.msk.f32.vlgmr.msra.gmra.mxu1 %vm227_vm2, %v214_v45  ;;  %605 = vmatprep.subr.mxu1 %v645_v2 }
 0x118   :  { %609 = vmatprep.mubr.msk.f32.mxu1 %vm646_vm1, %v645_v2 }
 0x1d7   :  { %v604_v47 = vpop.f32.mrf.mxu1 }
 0x1d8   :  { %v306_v48 = vadd.f32 %v604_v47, %v225_v46 }
 0x1d9   :  { %v300_v50 = vpop.f32.mrf.mxu1 }
 0x1da   :  { %v310_v51 = vmax.f32 %v306_v48, 0.0  ;;  %v301_v52 = vadd.f32 %v300_v50, %v220_v49 }
 0x1dc   :  { %v309_v53 = vmax.f32 %v301_v52, 0.0  ;;  %606 = vmatpush3.msk.msra.mxu1 %vm322_vm3, %v310_v51 }
 0x1dd   :  { %607 = vmatprep.subr.mxu1 %v645_v2 }
 0x1de   :  { %608 = vmatpush3.msra.mxu1 %v309_v53 }
 0x1df   :  { %610 = vmatmul.mubr.msk.f32.vlgmr.msra.gmra.mxu1 %vm318_vm4, %v311_v54  ;;  %612 = vmatprep.subr.mxu1 %v645_v2 }
 0x1e0   :  { %614 = vmatprep.mubr.msk.f32.mxu1 %vm646_vm1, %v645_v2 }
 0x29f   :  { %v392_v56 = vpop.f32.mrf.mxu1 }
 0x2a0   :  { %v393_v57 = vadd.f32 %v392_v56, %v316_v55 }
 0x2a1   :  { %v611_v58 = vpop.f32.mrf.mxu1 }
 0x2a2   :  { %v396_v59 = vmax.f32 %v393_v57, 0.0 }
 0x2a4   :  { %613 = vmatpush3.msk.msra.mxu1 %vm412_vm5, %v396_v59 }
 0x2a5   :  { %615 = vmatmul.mubr.msk.f32.vlgmr.msra.gmra.mxu1 %vm408_vm6, %v397_v60 }
 0x365   :  { %v482_v2 = vpop.f32.mrf.mxu1 }
 0x366   :  { %v483_v3 = vadd.f32 %v482_v2, %v407_v1 }
 0x367   :  { %v616_v4 = vpop.f32.mrf.mxu1 }
 0x368   :  { %486 = vst [vmem:[#allocation3] sm:$0x1] %v483_v3 }
 0x369   :  { %634 = shalt.err (!%p631_p4)
}
 0x36a   :  { %496 = dma.vmem_to_hbm [thread:$0]  %s494_s15, 16, %s851_s9, [#allocation4]  }
 0x36b   :  { %643 = dma.done.wait [#allocation4], 16  }
 0x36c   :  { %644 = vsyncadd [#allocation4], 4294967280 }
 0x36d   :  { %500 = vsyncpa [#allocation4], 1 }

</bundles_post_ra>
